<compile_context>
chip_gen: v7x
topology: tpu7x:2x2x1
jax: 0.10.0
libtpu: 0.0.40
codegen_flags: <defaults>
</compile_context>

<pallas_src>
import jax
import jax.numpy as jnp
from jax import lax
from jax.experimental import pallas as pl
from jax.experimental.pallas import tpu as pltpu


def _round_up(x, m):
    return ((x + m - 1) // m) * m


_VMEM_LIMIT = 32 * 1024 * 1024   # explicit scoped-VMEM limit (safe on v5e/v6e/v7x)
_WS_BUDGET = 12 * 1024 * 1024    # per-kernel working-set budget (v5e-safe, v7x headroom)


# --------------------------------------------------------------------------
# Shared tiled matmul (+bias): parallel (M, N) grid, "arbitrary" K reduction,
# f32 VMEM accumulator, bias folded in at the last K step, lane-dense stores.
# --------------------------------------------------------------------------
def _matmul_bias_kernel(x_ref, w_ref, b_ref, o_ref, acc_ref):
    @pl.when(pl.program_id(2) == 0)
    def _():
        acc_ref[...] = jnp.zeros_like(acc_ref)

    acc_ref[...] += jnp.dot(x_ref[...], w_ref[...],
                            preferred_element_type=jnp.float32)

    @pl.when(pl.program_id(2) == pl.num_programs(2) - 1)
    def _():
        o_ref[...] = (acc_ref[...] + b_ref[...].astype(jnp.float32)
                      ).astype(o_ref.dtype)


def _pick_tiles(MP, NP, K, in_bytes, out_bytes, budget):
    """Largest (tn, tm, tk) (in that priority) whose working set fits budget."""
    tns = [t for t in (512, 256, 128) if NP % t == 0] or [NP]
    tms = [t for t in (256, 128, 64, 32, 16, 8) if MP % t == 0] or [MP]
    tks = [t for t in (2048, 1024, 512, 256, 128) if K % t == 0] or [K]

    def ws(tm, tn, tk):
        return (2 * (tm * tk + tk * tn) * in_bytes   # double-buffered inputs
                + 2 * tm * tn * out_bytes            # double-buffered output
                + tm * tn * 4                        # f32 accumulator scratch
                + 2 * tn * 4)                        # bias tile

    for tn in tns:
        for tm in tms:
            for tk in tks:
                if ws(tm, tn, tk) <= budget:
                    return tm, tn, tk
    return tms[-1], tns[-1], tks[-1]


def _pallas_matmul_bias(x, w, b, *, compute_dtype=jnp.bfloat16,
                        out_dtype=jnp.float32):
    """out = x @ w + b.  Pads M to 8 sublanes and N to 128 lanes internally so
    every output tile is lane-dense, then slices the padding off."""
    M, K = x.shape
    N = w.shape[1]
    MP = _round_up(max(M, 8), 8)
    NP = _round_up(max(N, 128), 128)

    x_p = x.astype(compute_dtype)
    if MP != M:
        x_p = jnp.zeros((MP, K), compute_dtype).at[:M].set(x_p)
    w_p = w.astype(compute_dtype)
    b_p = b.astype(jnp.float32)
    if NP != N:
        w_p = jnp.zeros((K, NP), compute_dtype).at[:, :N].set(w_p)
        b_p = jnp.zeros((1, NP), jnp.float32).at[:, :N].set(b_p)

    in_bytes = jnp.dtype(compute_dtype).itemsize
    out_bytes = jnp.dtype(out_dtype).itemsize
    tm, tn, tk = _pick_tiles(MP, NP, K, in_bytes, out_bytes, _WS_BUDGET)

    out = pl.pallas_call(
        _matmul_bias_kernel,
        out_shape=jax.ShapeDtypeStruct((MP, NP), out_dtype),
        grid=(MP // tm, NP // tn, K // tk),
        in_specs=[
            pl.BlockSpec((tm, tk), lambda i, j, k: (i, k)),
            pl.BlockSpec((tk, tn), lambda i, j, k: (k, j)),
            pl.BlockSpec((1, tn), lambda i, j, k: (0, j)),
        ],
        out_specs=pl.BlockSpec((tm, tn), lambda i, j, k: (i, j)),
        scratch_shapes=[pltpu.VMEM((tm, tn), jnp.float32)],
        compiler_params=pltpu.CompilerParams(
            dimension_semantics=("parallel", "parallel", "arbitrary"),
            vmem_limit_bytes=_VMEM_LIMIT),
    )(x_p, w_p, b_p)
    return out[:M, :N] if (MP != M or NP != N) else out


# --------------------------------------------------------------------------
# LSTM recurrence, streamed over time.  Grid = (batch_chunks, T):
#   * batch-chunk axis is "parallel" (feeds both v7x TensorCores when BP>=16),
#   * time axis is "arbitrary" (sequential), xw[t] loads and h_out[t] stores
#     are double-buffered by BlockSpec behind the h @ Wh dependency chain,
#   * h/c live in f32 VMEM scratch and are reset at t == 0 of each chunk.
# --------------------------------------------------------------------------
def _lstm_step_kernel(xw_ref, wh_ref, h_out_ref, h_sc, c_sc):
    HP = h_sc.shape[-1]

    @pl.when(pl.program_id(1) == 0)          # new batch chunk -> reset state
    def _():
        h_sc[...] = jnp.zeros_like(h_sc)
        c_sc[...] = jnp.zeros_like(c_sc)

    gates = (xw_ref[0].astype(jnp.float32)
             + jnp.dot(h_sc[...].astype(wh_ref.dtype), wh_ref[...],
                       preferred_element_type=jnp.float32))
    # HP is a multiple of 128 -> every gate slice is lane-aligned.
    i_g = jax.nn.sigmoid(gates[:, 0 * HP:1 * HP])
    f_g = jax.nn.sigmoid(gates[:, 1 * HP:2 * HP])
    g_g = jnp.tanh(gates[:, 2 * HP:3 * HP])
    o_g = jax.nn.sigmoid(gates[:, 3 * HP:4 * HP])
    c_new = f_g * c_sc[...] + i_g * g_g
    h_new = o_g * jnp.tanh(c_new)
    c_sc[...] = c_new
    h_sc[...] = h_new
    h_out_ref[0] = h_new.astype(h_out_ref.dtype)


# --------------------------------------------------------------------------
# Wrappers
# --------------------------------------------------------------------------
def encoder_cnn_embed(pooled, We, be, *, compute_dtype=jnp.bfloat16):
    """EncoderCNN.forward tail: flatten(pooled features) -> Linear(feat, embed)."""
    # TODO(synk): the frozen pretrained resnet50 backbone has no self-contained
    # Pallas equivalent (pretrained weights unavailable in-script); we start
    # from its pooled (B, 2048) output and implement the embed Linear in Pallas.
    return _pallas_matmul_bias(pooled, We, be, compute_dtype=compute_dtype,
                               out_dtype=jnp.float32)


def decoder_rnn_forward(features, captions, params, *, compute_dtype=jnp.bfloat16):
    """features: (B, E) f32, captions: (B, Tcap) i32 -> scores (B, Tcap, V)."""
    emb_table = params["embedding"]          # (V, E)
    Wx = params["Wx"]                        # (E, 4H)
    Wh = params["Wh"]                        # (H, 4H)
    b = params["b"]                          # (1, 4H)
    Wo = params["Wo"]                        # (H, V)
    bo = params["bo"]                        # (1, V)

    B, E = features.shape
    H = Wh.shape[0]
    V = Wo.shape[1]

    # Plain-JAX glue: embedding lookup + concat, then time-major.
    emb = jnp.take(emb_table, captions[:, :-1], axis=0)            # (B, Tcap-1, E)
    inputs = jnp.concatenate([features[:, None, :].astype(jnp.float32), emb],
                             axis=1)                                # (B, T, E)
    T = inputs.shape[1]
    x_tbe = jnp.transpose(inputs, (1, 0, 2)).astype(jnp.float32)    # (T, B, E)

    # ---- TPU-friendly padding -------------------------------------------
    BP = _round_up(max(B, 8), 8)     # sublane-aligned batch
    HP = _round_up(H, 128)           # lane-aligned hidden -> aligned gate slices
    VP = _round_up(V, 128)           # lane-dense vocab projection output

    def pad_gates_cols(w, rows_to):
        # (rows, 4H) -> (rows_to, 4*HP): each gate block moved to stride HP.
        rows = w.shape[0]
        out = jnp.zeros((rows_to, 4 * HP), jnp.float32)
        for k in range(4):
            out = out.at[:rows, k * HP:k * HP + H].set(w[:, k * H:(k + 1) * H])
        return out

    Wx_p = pad_gates_cols(Wx, E)                                    # (E, 4HP)
    Wh_p = pad_gates_cols(Wh, HP)                                   # (HP, 4HP)
    b_p = pad_gates_cols(b, 1)                                      # (1, 4HP)
    Wo_p = jnp.zeros((HP, VP), jnp.float32).at[:H, :V].set(Wo)      # (HP, VP)
    bo_p = jnp.zeros((1, VP), jnp.float32).at[:, :V].set(bo)        # (1, VP)

    x_pad = jnp.zeros((T, BP, E), jnp.float32).at[:, :B, :].set(x_tbe)

    # ---- 1) hoisted input projection: one big parallel matmul (bias folded),
    #         emitted in the compute dtype (bf16) to halve HBM traffic.
    xw = _pallas_matmul_bias(x_pad.reshape(T * BP, E), Wx_p, b_p,
                             compute_dtype=compute_dtype,
                             out_dtype=compute_dtype)
    xw = xw.reshape(T, BP, 4 * HP)

    # ---- 2) streamed sequential recurrence ---------------------------------
    n_bc = 2 if BP % 16 == 0 else 1          # 2-way batch split for v7x megacore
    Bc = BP // n_bc

    h_all = pl.pallas_call(
        _lstm_step_kernel,
        out_shape=jax.ShapeDtypeStruct((T, BP, HP), compute_dtype),
        grid=(n_bc, T),
        in_specs=[
            pl.BlockSpec((1, Bc, 4 * HP), lambda bi, t: (t, bi, 0)),
            pl.BlockSpec((HP, 4 * HP), lambda bi, t: (0, 0)),
        ],
        out_specs=pl.BlockSpec((1, Bc, HP), lambda bi, t: (t, bi, 0)),
        scratch_shapes=[pltpu.VMEM((Bc, HP), jnp.float32),   # h state
                        pltpu.VMEM((Bc, HP), jnp.float32)],  # c state
        compiler_params=pltpu.CompilerParams(
            dimension_semantics=("parallel", "arbitrary"),
            vmem_limit_bytes=_VMEM_LIMIT),
    )(xw, Wh_p.astype(compute_dtype))

    # ---- 3) vocab projection: separate parallel, lane-dense matmul ----------
    # (Further win available by fusing this into the recurrence to fill MXU
    #  slack and remove the h_all HBM round trip; kept separate for clarity.)
    scores_flat = _pallas_matmul_bias(h_all.reshape(T * BP, HP), Wo_p, bo_p,
                                      compute_dtype=compute_dtype,
                                      out_dtype=jnp.float32)          # (T*BP, VP)
    scores = scores_flat.reshape(T, BP, VP)[:, :B, :V]
    return jnp.transpose(scores, (1, 0, 2))   # (B, T, V) — batch_first


# --------------------------------------------------------------------------
# Pure-JAX reference (PyTorch semantics) + param construction
# --------------------------------------------------------------------------
def _reference_forward(features, captions, params):
    emb = jnp.take(params["embedding"], captions[:, :-1], axis=0)
    inputs = jnp.concatenate([features[:, None, :], emb], axis=1)  # (B, T, E)
    B, T, _ = inputs.shape
    H = params["Wh"].shape[0]

    def step(carry, x_t):
        h, c = carry
        gates = x_t @ params["Wx"] + h @ params["Wh"] + params["b"][0]
        i = jax.nn.sigmoid(gates[:, 0 * H:1 * H])
        f = jax.nn.sigmoid(gates[:, 1 * H:2 * H])
        g = jnp.tanh(gates[:, 2 * H:3 * H])
        o = jax.nn.sigmoid(gates[:, 3 * H:4 * H])
        c = f * c + i * g
        h = o * jnp.tanh(c)
        return (h, c), h

    h0 = jnp.zeros((B, H), jnp.float32)
    c0 = jnp.zeros((B, H), jnp.float32)
    _, hs = lax.scan(step, (h0, c0), jnp.transpose(inputs, (1, 0, 2)))
    hs = jnp.transpose(hs, (1, 0, 2))                     # (B, T, H)
    return hs @ params["Wo"] + params["bo"][0]            # (B, T, V)


def make_params(key, embed_size, hidden_size, vocab_size):
    ks = jax.random.split(key, 7)
    k_lstm = 1.0 / jnp.sqrt(hidden_size)
    k_lin = 1.0 / jnp.sqrt(hidden_size)
    u = lambda k, shape, bound: jax.random.uniform(
        k, shape, jnp.float32, minval=-bound, maxval=bound)
    W_ih = u(ks[0], (4 * hidden_size, embed_size), k_lstm)   # PyTorch layout
    W_hh = u(ks[1], (4 * hidden_size, hidden_size), k_lstm)
    b_ih = u(ks[2], (4 * hidden_size,), k_lstm)
    b_hh = u(ks[3], (4 * hidden_size,), k_lstm)
    W_lin = u(ks[4], (vocab_size, hidden_size), k_lin)
    b_lin = u(ks[5], (vocab_size,), k_lin)
    emb = jax.random.normal(ks[6], (vocab_size, embed_size), jnp.float32)
    return {
        "embedding": emb,
        "Wx": W_ih.T,                              # (E, 4H)
        "Wh": W_hh.T,                              # (H, 4H)
        "b": (b_ih + b_hh)[None, :],               # (1, 4H)
        "Wo": W_lin.T,                             # (H, V)
        "bo": b_lin[None, :],                      # (1, V)
    }


if __name__ == "__main__":
    embed_size, hidden_size, vocab_size = 32, 32, 64
    B, Tcap = 2, 8
    feat_dim = 2048   # resnet50 avgpool output size (resnet.fc.in_features)

    key = jax.random.PRNGKey(0)
    k_img, k_cap, k_dec, k_we, k_be = jax.random.split(key, 5)

    dec_params = make_params(k_dec, embed_size, hidden_size, vocab_size)
    bound = feat_dim ** -0.5
    We = jax.random.uniform(k_we, (feat_dim, embed_size), jnp.float32, -bound, bound)
    be = jax.random.uniform(k_be, (1, embed_size), jnp.float32, -bound, bound)

    pooled = jax.random.normal(k_img, (B, feat_dim), jnp.float32)   # resnet pooled feats
    captions = jax.random.randint(k_cap, (B, Tcap), 0, vocab_size, jnp.int32)

    # Pure-JAX reference (f32).
    ref_features = pooled @ We + be[0]
    ref_scores = jax.block_until_ready(
        _reference_forward(ref_features, captions, dec_params))

    # ---- f32 Pallas path: tight numerical self-check -----------------------
    feats_f32 = encoder_cnn_embed(pooled, We, be, compute_dtype=jnp.float32)
    scores_f32 = jax.block_until_ready(
        decoder_rnn_forward(feats_f32, captions, dec_params,
                            compute_dtype=jnp.float32))
    assert scores_f32.shape == (B, Tcap, vocab_size), scores_f32.shape
    assert jnp.allclose(feats_f32, ref_features, atol=1e-3, rtol=1e-3), \
        float(jnp.max(jnp.abs(feats_f32 - ref_features)))
    assert jnp.allclose(scores_f32, ref_scores, atol=2e-3, rtol=2e-3), \
        float(jnp.max(jnp.abs(scores_f32 - ref_scores)))

    # ---- bf16-MXU Pallas path (f32 accumulation, f32 gate/state math):
    #      the performance configuration; checked with a looser tolerance -----
    feats_bf16 = encoder_cnn_embed(pooled, We, be, compute_dtype=jnp.bfloat16)
    scores_bf16 = jax.block_until_ready(
        decoder_rnn_forward(feats_bf16, captions, dec_params,
                            compute_dtype=jnp.bfloat16))
    assert scores_bf16.shape == (B, Tcap, vocab_size), scores_bf16.shape
    assert jnp.allclose(feats_bf16, ref_features, atol=2e-2, rtol=2e-2), \
        float(jnp.max(jnp.abs(feats_bf16 - ref_features)))
    assert jnp.allclose(scores_bf16, ref_scores, atol=7e-2, rtol=7e-2), \
        float(jnp.max(jnp.abs(scores_bf16 - ref_scores)))

    print("KERNEL_OK")
</pallas_src>

<mosaic_0001>
module attributes {stable_mosaic.version = 11 : i64} {
  func.func @_matmul_bias_kernel(%arg0: i32, %arg1: i32, %arg2: i32, %arg3: memref<8x2048xf32, #tpu.memory_space<vmem>>, %arg4: memref<2048x128xf32, #tpu.memory_space<vmem>>, %arg5: memref<1x128xf32, #tpu.memory_space<vmem>>, %arg6: memref<8x128xf32, #tpu.memory_space<vmem>>, %arg7: memref<8x128xf32, #tpu.memory_space<vmem>>) attributes {dimension_semantics = [#tpu.dimension_semantics<parallel>, #tpu.dimension_semantics<parallel>, #tpu.dimension_semantics<arbitrary>], iteration_bounds = array<i64: 1, 1, 1>, scalar_prefetch = 0 : i64, scratch_operands = 1 : i64, tpu.core_type = #tpu.core_type<tc>, window_params = [{transform_indices = @transform_0, window_bounds = array<i64: 8, 2048>}, {transform_indices = @transform_1, window_bounds = array<i64: 2048, 128>}, {transform_indices = @transform_2, window_bounds = array<i64: 1, 128>}, {transform_indices = @transform_3, window_bounds = array<i64: 8, 128>}]} {
    %c0_i32 = arith.constant 0 : i32
    %0 = arith.cmpi eq, %arg2, %c0_i32 : i32
    %1 = arith.extui %0 : i1 to i32
    %c0_i32_0 = arith.constant 0 : i32
    %2 = arith.cmpi ne, %1, %c0_i32_0 : i32
    scf.if %2 {
      %cst_10 = arith.constant 0.000000e+00 : f32
      %12 = vector.broadcast %cst_10 : f32 to vector<8x128xf32>
      %c0_11 = arith.constant 0 : index
      %c0_12 = arith.constant 0 : index
      %13 = vector.load %arg7[%c0_11, %c0_12] : memref<8x128xf32, #tpu.memory_space<vmem>>, vector<8x128xf32>
      tpu.vector_store %arg7[%c0_11, %c0_12], %12 {strides = array<i32>} : memref<8x128xf32, #tpu.memory_space<vmem>>, vector<8x128xf32>,
    } else {
    }
    %c0 = arith.constant 0 : index
    %c0_1 = arith.constant 0 : index
    %3 = vector.load %arg7[%c0, %c0_1] : memref<8x128xf32, #tpu.memory_space<vmem>>, vector<8x128xf32>
    %c0_2 = arith.constant 0 : index
    %c0_3 = arith.constant 0 : index
    %4 = vector.load %arg3[%c0_2, %c0_3] : memref<8x2048xf32, #tpu.memory_space<vmem>>, vector<8x2048xf32>
    %c0_4 = arith.constant 0 : index
    %c0_5 = arith.constant 0 : index
    %5 = vector.load %arg4[%c0_4, %c0_5] : memref<2048x128xf32, #tpu.memory_space<vmem>>, vector<2048x128xf32>
    %cst = arith.constant dense<0.000000e+00> : vector<8x128xf32>
    %6 = tpu.matmul %4, %5, %cst {dimension_numbers = #tpu.dot_dimension_numbers<[1], [0], [0], [1], [0, 0, 1, 1], [], []>} : vector<8x2048xf32>, vector<2048x128xf32>, vector<8x128xf32> -> vector<8x128xf32>
    %7 = arith.addf %3, %6 : vector<8x128xf32>
    %c0_6 = arith.constant 0 : index
    %c0_7 = arith.constant 0 : index
    %8 = vector.load %arg7[%c0_6, %c0_7] : memref<8x128xf32, #tpu.memory_space<vmem>>, vector<8x128xf32>
    tpu.vector_store %arg7[%c0_6, %c0_7], %7 {strides = array<i32>} : memref<8x128xf32, #tpu.memory_space<vmem>>, vector<8x128xf32>,
    %c0_i32_8 = arith.constant 0 : i32
    %9 = arith.cmpi eq, %arg2, %c0_i32_8 : i32
    %10 = arith.extui %9 : i1 to i32
    %c0_i32_9 = arith.constant 0 : i32
    %11 = arith.cmpi ne, %10, %c0_i32_9 : i32
    scf.if %11 {
      %c0_10 = arith.constant 0 : index
      %c0_11 = arith.constant 0 : index
      %12 = vector.load %arg7[%c0_10, %c0_11] : memref<8x128xf32, #tpu.memory_space<vmem>>, vector<8x128xf32>
      %c0_12 = arith.constant 0 : index
      %c0_13 = arith.constant 0 : index
      %13 = vector.load %arg5[%c0_12, %c0_13] : memref<1x128xf32, #tpu.memory_space<vmem>>, vector<1x128xf32>
      %14 = vector.broadcast %13 : vector<1x128xf32> to vector<8x128xf32>
      %15 = arith.addf %12, %14 : vector<8x128xf32>
      %c0_14 = arith.constant 0 : index
      %c0_15 = arith.constant 0 : index
      %16 = vector.load %arg6[%c0_14, %c0_15] : memref<8x128xf32, #tpu.memory_space<vmem>>, vector<8x128xf32>
      tpu.vector_store %arg6[%c0_14, %c0_15], %15 {strides = array<i32>} : memref<8x128xf32, #tpu.memory_space<vmem>>, vector<8x128xf32>,
    } else {
    }
    return
  }
  func.func @transform_0(%arg0: i32, %arg1: i32, %arg2: i32) -> (i32, i32) {
    %c0_i32 = arith.constant 0 : i32
    return %arg0, %arg2 : i32, i32
  }
  func.func @transform_1(%arg0: i32, %arg1: i32, %arg2: i32) -> (i32, i32) {
    %c0_i32 = arith.constant 0 : i32
    return %arg2, %arg1 : i32, i32
  }
  func.func @transform_2(%arg0: i32, %arg1: i32, %arg2: i32) -> (i32, i32) {
    %c0_i32 = arith.constant 0 : i32
    %c0_i32_0 = arith.constant 0 : i32
    return %c0_i32, %arg1 : i32, i32
  }
  func.func @transform_3(%arg0: i32, %arg1: i32, %arg2: i32) -> (i32, i32) {
    %c0_i32 = arith.constant 0 : i32
    return %arg0, %arg1 : i32, i32
  }
}

</mosaic_0001>

<bundles_post_ra>
// kernel: tpu_custom_call.1
= control target key start
LH: loop header
LB: loop body
LE: loop exit
PB: predicated region body
PF: predicated region fallthrough
CT: control target
= control target key end

     0   :  { %8 = vsyncpa [#allocation4], 0  ;;  %s1595_s0 = inlined_call_operand.hbm [shape: f32[8,2048], index: 0, kind: input, shape index: {}]   ;;  %s1596_s1 = inlined_call_operand.hbm [shape: f32[2048,128], index: 1, kind: input, shape index: {}]   ;;  %s1597_s2 = inlined_call_operand.vmem [shape: f32[1,128], index: 2, kind: input, shape index: {}]   ;;  %s1598_s3 = inlined_call_operand.hbm [shape: f32[8,128], index: 3, kind: output, shape index: {}]  }
   0x1   :  { %9 = vsyncpa [#allocation7], 0 }
   0x2   :  { %10 = vsyncpa [#allocation5], 0  ;;  %s1524_s12 = smov [#allocation3]   ;;  %s1525_s14 = smov [#allocation6]  }
   0x3   :  { %s17_s13 = sshll.u32 %s1524_s12, 4  ;;  %s26_s15 = sshll.u32 %s1525_s14, 4  ;;  %s18_s13 = int_to_ptr.vmem [resolvable:$true] %s17_s13  ;;  %s1549_s15 = int_to_ptr.vmem [resolvable:$true] %s26_s15 }
   0x4   :  { %s1452_s18 = scalar_lea.hbm %s1595_s0, 2048 }
   0x5   :  { %p1453_p0 = scmp.ne.s32.totalorder %s1595_s0, %s1452_s18  ;;  %p1456_p1 = scmp.lt.u32.totalorder %s1452_s18, %s1595_s0 }
   0x7   :  { %p1458_p2 = pnand %p1456_p1, %p1453_p0 }
   0x9   :  { %1461 = shalt.err (!%p1458_p2)
}
   0xa   :  { %s1462_s23 = scalar_lea.vmem %s18_s13, 2048  ;;  %p1467_p4 = scmp.lt.s32.totalorder %s18_s13, %s18_s13 }
   0xb   :  { %p1463_p3 = scmp.ne.s32.totalorder %s18_s13, %s1462_s23  ;;  %p1468_p5 = scmp.lt.s32.totalorder %s1462_s23, %s1462_s23 }
   0xd   :  { %p1469_p6 = por %p1468_p5, %p1467_p4 }
   0xf   :  { %p1470_p7 = pnand %p1469_p6, %p1463_p3 }
  0x11   :  { %1473 = shalt.err (!%p1470_p7)
}
  0x12   :  { %20 = dma.hbm_to_vmem [thread:$0]  %s1595_s0, 2048, %s18_s13, [#allocation4]  }
  0x13   :  { %s1474_s28 = scalar_lea.hbm %s1596_s1, 32768 }
  0x14   :  { %p1475_p8 = scmp.ne.s32.totalorder %s1596_s1, %s1474_s28  ;;  %p1478_p9 = scmp.lt.u32.totalorder %s1474_s28, %s1596_s1 }
  0x16   :  { %p1480_p10 = pnand %p1478_p9, %p1475_p8 }
  0x18   :  { %1483 = shalt.err (!%p1480_p10)
}
  0x19   :  { %s1484_s6 = scalar_lea.vmem %s1549_s15, 32768  ;;  %p1489_p12 = scmp.lt.s32.totalorder %s1549_s15, %s1549_s15 }
  0x1a   :  { %p1485_p11 = scmp.ne.s32.totalorder %s1549_s15, %s1484_s6  ;;  %p1490_p13 = scmp.lt.s32.totalorder %s1484_s6, %s1484_s6 }
  0x1c   :  { %p1491_p0 = por %p1490_p13, %p1489_p12 }
  0x1e   :  { %p1492_p1 = pnand %p1491_p0, %p1485_p11 }
  0x20   :  { %1495 = shalt.err (!%p1492_p1)
}
  0x21   :  { %s1526_s0 = smov 128   ;;  %s1527_s7 = smov 8  }
  0x22   :  { %32 = dma.hbm_to_vmem [thread:$0]  %s1596_s1, 32768, %s1549_s15, [#allocation7], %s1526_s0, %s1526_s0, %s1527_s7  }
  0x23   :  { %1518 = dma.done.wait [#allocation4], 2048  }
  0x24   :  { %1519 = vsyncadd [#allocation4], 4294965248 }
  0x25   :  { %1520 = dma.done.wait [#allocation7], 32768  }
  0x26   :  { %1521 = vsyncadd [#allocation7], 4294934528  ;;  %v79_v0 = vld [vmem:[#allocation6 + $0x80] sm:$0xff]  ;;  %v80_v1 = vld [vmem:[#allocation6 + $0x88] sm:$0xff]  ;;  %s1528_s11 = smov [#allocation8]  }
  0x27   :  { %v111_v2 = vld [vmem:[#allocation6 + $0x180] sm:$0xff]  ;;  %v1191_v3 = vpack.c.bf16 %v80_v1, %v79_v0  ;;  %v112_v4 = vld [vmem:[#allocation6 + $0x188] sm:$0xff]  ;;  %v81_v11 = vld [vmem:[#allocation6 + $0x90] sm:$0xff]  ;;  %s900_s12 = sshll.u32 %s1528_s11, 4  ;;  %s901_s12 = int_to_ptr.vmem [resolvable:$true] %s900_s12 }
  0x28   :  { %v63_v5 = vld [vmem:[#allocation6] sm:$0xff]  ;;  %v64_v6 = vld [vmem:[#allocation6 + $0x8] sm:$0xff]  ;;  %v1223_v7 = vpack.c.bf16 %v112_v4, %v111_v2  ;;  %v82_v13 = vld [vmem:[#allocation6 + $0x98] sm:$0xff]  ;;  %s1496_s13 = scalar_lea.vmem %s901_s12, 128  ;;  %p1501_p3 = scmp.lt.s32.totalorder %s901_s12, %s901_s12 }
  0x29   :  { %v1193_v8 = vpack.c.bf16 %v64_v6, %v63_v5  ;;  %v95_v9 = vld [vmem:[#allocation6 + $0x100] sm:$0xff]  ;;  %v96_v10 = vld [vmem:[#allocation6 + $0x108] sm:$0xff]  ;;  %1192 = vmatprep.subr.bf16.mxu0 %v1191_v3  ;;  %v113_v14 = vld [vmem:[#allocation6 + $0x190] sm:$0xff]  ;;  %v1195_v16 = vpack.c.bf16 %v82_v13, %v81_v11  ;;  %p1497_p2 = scmp.ne.s32.totalorder %s901_s12, %s1496_s13  ;;  %p1502_p4 = scmp.lt.s32.totalorder %s1496_s13, %s1496_s13 }
  0x2a   :  { %v1225_v12 = vpack.c.bf16 %v96_v10, %v95_v9  ;;  %v114_v15 = vld [vmem:[#allocation6 + $0x198] sm:$0xff]  ;;  %1224 = vmatprep.subr.bf16.mxu1 %v1223_v7  ;;  %v65_v18 = vld [vmem:[#allocation6 + $0x10] sm:$0xff]  ;;  %v83_v23 = vld [vmem:[#allocation6 + $0xa0] sm:$0xff] }
  0x2b   :  { %1194 = vmatpush3.bf16.msra.mxu0 %v1193_v8  ;;  %v1227_v17 = vpack.c.bf16 %v114_v15, %v113_v14  ;;  %v66_v19 = vld [vmem:[#allocation6 + $0x18] sm:$0xff]  ;;  %v97_v20 = vld [vmem:[#allocation6 + $0x110] sm:$0xff]  ;;  %v84_v24 = vld [vmem:[#allocation6 + $0xa8] sm:$0xff]  ;;  %p1503_p5 = por %p1502_p4, %p1501_p3 }
  0x2c   :  { %1226 = vmatpush3.bf16.msra.mxu1 %v1225_v12  ;;  %v1197_v21 = vpack.c.bf16 %v66_v19, %v65_v18  ;;  %v98_v22 = vld [vmem:[#allocation6 + $0x118] sm:$0xff]  ;;  %1196 = vmatprep.subr.bf16.mxu0 %v1195_v16  ;;  %v1199_v26 = vpack.c.bf16 %v84_v24, %v83_v23  ;;  %v115_v27 = vld [vmem:[#allocation6 + $0x1a0] sm:$0xff]  ;;  %v116_v28 = vld [vmem:[#allocation6 + $0x1a8] sm:$0xff] }
  0x2d   :  { %1228 = vmatprep.subr.bf16.mxu1 %v1227_v17  ;;  %v1229_v25 = vpack.c.bf16 %v98_v22, %v97_v20  ;;  %v67_v29 = vld [vmem:[#allocation6 + $0x20] sm:$0xff]  ;;  %v1231_v30 = vpack.c.bf16 %v116_v28, %v115_v27  ;;  %v68_v31 = vld [vmem:[#allocation6 + $0x28] sm:$0xff]  ;;  %v85_v35 = vld [vmem:[#allocation6 + $0xb0] sm:$0xff]  ;;  %p1504_p6 = pnand %p1503_p5, %p1497_p2 }
  0x2e   :  { %v99_v32 = vld [vmem:[#allocation6 + $0x120] sm:$0xff]  ;;  %v100_v33 = vld [vmem:[#allocation6 + $0x128] sm:$0xff]  ;;  %v1201_v34 = vpack.c.bf16 %v68_v31, %v67_v29  ;;  %v86_v36 = vld [vmem:[#allocation6 + $0xb8] sm:$0xff] }
  0x2f   :  { %1198 = vmatpush3.bf16.msra.mxu0 %v1197_v21  ;;  %v117_v37 = vld [vmem:[#allocation6 + $0x1b0] sm:$0xff]  ;;  %v1233_v38 = vpack.c.bf16 %v100_v33, %v99_v32  ;;  %v1203_v39 = vpack.c.bf16 %v86_v36, %v85_v35  ;;  %v118_v40 = vld [vmem:[#allocation6 + $0x1b8] sm:$0xff]  ;;  %v87_v46 = vld [vmem:[#allocation6 + $0xc0] sm:$0xff] }
  0x30   :  { %1230 = vmatpush3.bf16.msra.mxu1 %v1229_v25  ;;  %1200 = vmatprep.subr.bf16.mxu0 %v1199_v26  ;;  %v69_v41 = vld [vmem:[#allocation6 + $0x30] sm:$0xff]  ;;  %v70_v42 = vld [vmem:[#allocation6 + $0x38] sm:$0xff]  ;;  %v1235_v43 = vpack.c.bf16 %v118_v40, %v117_v37  ;;  %v88_v47 = vld [vmem:[#allocation6 + $0xc8] sm:$0xff] }
  0x31   :  { %1232 = vmatprep.subr.bf16.mxu1 %v1231_v30  ;;  %v101_v44 = vld [vmem:[#allocation6 + $0x130] sm:$0xff]  ;;  %v102_v45 = vld [vmem:[#allocation6 + $0x138] sm:$0xff]  ;;  %v119_v48 = vld [vmem:[#allocation6 + $0x1c0] sm:$0xff]  ;;  %v1205_v50 = vpack.c.bf16 %v70_v42, %v69_v41  ;;  %v1207_v52 = vpack.c.bf16 %v88_v47, %v87_v46 }
  0x32   :  { %v120_v49 = vld [vmem:[#allocation6 + $0x1c8] sm:$0xff]  ;;  %v1237_v51 = vpack.c.bf16 %v102_v45, %v101_v44  ;;  %v71_v53 = vld [vmem:[#allocation6 + $0x40] sm:$0xff]  ;;  %v89_v58 = vld [vmem:[#allocation6 + $0xd0] sm:$0xff] }
  0x33   :  { %1202 = vmatpush3.bf16.msra.mxu0 %v1201_v34  ;;  %v72_v54 = vld [vmem:[#allocation6 + $0x48] sm:$0xff]  ;;  %v103_v55 = vld [vmem:[#allocation6 + $0x140] sm:$0xff]  ;;  %v1239_v56 = vpack.c.bf16 %v120_v49, %v119_v48  ;;  %v90_v59 = vld [vmem:[#allocation6 + $0xd8] sm:$0xff] }
  0x34   :  { %1234 = vmatpush3.bf16.msra.mxu1 %v1233_v38  ;;  %1204 = vmatprep.subr.bf16.mxu0 %v1203_v39  ;;  %v104_v57 = vld [vmem:[#allocation6 + $0x148] sm:$0xff]  ;;  %v121_v60 = vld [vmem:[#allocation6 + $0x1d0] sm:$0xff]  ;;  %v122_v61 = vld [vmem:[#allocation6 + $0x1d8] sm:$0xff]  ;;  %v1209_v62 = vpack.c.bf16 %v72_v54, %v71_v53  ;;  %v1211_v0 = vpack.c.bf16 %v90_v59, %v89_v58 }
  0x35   :  { %1236 = vmatprep.subr.bf16.mxu1 %v1235_v43  ;;  %v1241_v63 = vpack.c.bf16 %v104_v57, %v103_v55  ;;  %v73_v1 = vld [vmem:[#allocation6 + $0x50] sm:$0xff]  ;;  %v74_v2 = vld [vmem:[#allocation6 + $0x58] sm:$0xff]  ;;  %v1243_v4 = vpack.c.bf16 %v122_v61, %v121_v60  ;;  %v91_v6 = vld [vmem:[#allocation6 + $0xe0] sm:$0xff] }
  0x36   :  { %v105_v3 = vld [vmem:[#allocation6 + $0x150] sm:$0xff]  ;;  %v106_v5 = vld [vmem:[#allocation6 + $0x158] sm:$0xff]  ;;  %v92_v7 = vld [vmem:[#allocation6 + $0xe8] sm:$0xff]  ;;  %v1213_v10 = vpack.c.bf16 %v74_v2, %v73_v1 }
  0x37   :  { %1206 = vmatpush3.bf16.msra.mxu0 %v1205_v50  ;;  %v123_v8 = vld [vmem:[#allocation6 + $0x1e0] sm:$0xff]  ;;  %v124_v9 = vld [vmem:[#allocation6 + $0x1e8] sm:$0xff]  ;;  %v1245_v13 = vpack.c.bf16 %v106_v5, %v105_v3  ;;  %v1215_v14 = vpack.c.bf16 %v92_v7, %v91_v6  ;;  %v50_v17 = vld [vmem:[#allocation3 + $0x18] sm:$0xff] }
  0x38   :  { %1238 = vmatpush3.bf16.msra.mxu1 %v1237_v51  ;;  %1208 = vmatprep.subr.bf16.mxu0 %v1207_v52  ;;  %v75_v11 = vld [vmem:[#allocation6 + $0x60] sm:$0xff]  ;;  %v76_v12 = vld [vmem:[#allocation6 + $0x68] sm:$0xff]  ;;  %v1247_v18 = vpack.c.bf16 %v124_v9, %v123_v8  ;;  %v93_v20 = vld [vmem:[#allocation6 + $0xf0] sm:$0xff] }
  0x39   :  { %1240 = vmatprep.subr.bf16.mxu1 %v1239_v56  ;;  %v107_v15 = vld [vmem:[#allocation6 + $0x160] sm:$0xff]  ;;  %v48_v16 = vld [vmem:[#allocation3 + $0x8] sm:$0xff]  ;;  %v94_v21 = vld [vmem:[#allocation6 + $0xf8] sm:$0xff]  ;;  %453 = vmatprep.mubr.f32.mxu1 %v50_v17  ;;  %v1217_v24 = vpack.c.bf16 %v76_v12, %v75_v11 }
  0x3a   :  { %v108_v19 = vld [vmem:[#allocation6 + $0x168] sm:$0xff]  ;;  %383 = vmatprep.mubr.f32.mxu0 %v48_v16  ;;  %v125_v22 = vld [vmem:[#allocation6 + $0x1f0] sm:$0xff]  ;;  %v126_v23 = vld [vmem:[#allocation6 + $0x1f8] sm:$0xff]  ;;  %v1219_v26 = vpack.c.bf16 %v94_v21, %v93_v20 }
  0x3b   :  { %1210 = vmatpush3.bf16.msra.mxu0 %v1209_v62  ;;  %v1249_v25 = vpack.c.bf16 %v108_v19, %v107_v15  ;;  %v77_v27 = vld [vmem:[#allocation6 + $0x70] sm:$0xff]  ;;  %v78_v28 = vld [vmem:[#allocation6 + $0x78] sm:$0xff]  ;;  %v1251_v30 = vpack.c.bf16 %v126_v23, %v125_v22  ;;  %v143_v32 = vld [vmem:[#allocation6 + $0x280] sm:$0xff] }
  0x3c   :  { %1242 = vmatpush3.bf16.msra.mxu1 %v1241_v63  ;;  %1212 = vmatprep.subr.bf16.mxu0 %v1211_v0  ;;  %v109_v29 = vld [vmem:[#allocation6 + $0x170] sm:$0xff]  ;;  %v110_v31 = vld [vmem:[#allocation6 + $0x178] sm:$0xff]  ;;  %v144_v33 = vld [vmem:[#allocation6 + $0x288] sm:$0xff]  ;;  %v1221_v36 = vpack.c.bf16 %v78_v28, %v77_v27 }
  0x3d   :  { %1244 = vmatprep.subr.bf16.mxu1 %v1243_v4  ;;  %v175_v34 = vld [vmem:[#allocation6 + $0x380] sm:$0xff]  ;;  %v176_v35 = vld [vmem:[#allocation6 + $0x388] sm:$0xff]  ;;  %v1253_v37 = vpack.c.bf16 %v110_v31, %v109_v29  ;;  %v1255_v38 = vpack.c.bf16 %v144_v33, %v143_v32  ;;  %v145_v44 = vld [vmem:[#allocation6 + $0x290] sm:$0xff] }
  0x3e   :  { %v127_v39 = vld [vmem:[#allocation6 + $0x200] sm:$0xff]  ;;  %v128_v40 = vld [vmem:[#allocation6 + $0x208] sm:$0xff]  ;;  %v1287_v42 = vpack.c.bf16 %v176_v35, %v175_v34  ;;  %v146_v45 = vld [vmem:[#allocation6 + $0x298] sm:$0xff] }
  0x3f   :  { %1214 = vmatpush3.bf16.msra.mxu0 %v1213_v10  ;;  %v159_v41 = vld [vmem:[#allocation6 + $0x300] sm:$0xff]  ;;  %v160_v43 = vld [vmem:[#allocation6 + $0x308] sm:$0xff]  ;;  %v177_v46 = vld [vmem:[#allocation6 + $0x390] sm:$0xff]  ;;  %v1257_v50 = vpack.c.bf16 %v128_v40, %v127_v39  ;;  %v1259_v52 = vpack.c.bf16 %v146_v45, %v145_v44 }
  0x40   :  { %1246 = vmatpush3.bf16.msra.mxu1 %v1245_v13  ;;  %1216 = vmatprep.subr.bf16.mxu0 %v1215_v14  ;;  %v178_v47 = vld [vmem:[#allocation6 + $0x398] sm:$0xff]  ;;  %v47_v48 = vld [vmem:[#allocation3] sm:$0xff]  ;;  %v49_v49 = vld [vmem:[#allocation3 + $0x10] sm:$0xff]  ;;  %v1289_v51 = vpack.c.bf16 %v160_v43, %v159_v41 }
  0x41   :  { %1248 = vmatprep.subr.bf16.mxu1 %v1247_v18  ;;  %v129_v53 = vld [vmem:[#allocation6 + $0x210] sm:$0xff]  ;;  %v130_v54 = vld [vmem:[#allocation6 + $0x218] sm:$0xff]  ;;  %v1291_v56 = vpack.c.bf16 %v178_v47, %v177_v46  ;;  %v147_v58 = vld [vmem:[#allocation6 + $0x2a0] sm:$0xff] }
  0x42   :  { %v161_v55 = vld [vmem:[#allocation6 + $0x310] sm:$0xff]  ;;  %v162_v57 = vld [vmem:[#allocation6 + $0x318] sm:$0xff]  ;;  %v148_v59 = vld [vmem:[#allocation6 + $0x2a8] sm:$0xff]  ;;  %v1261_v62 = vpack.c.bf16 %v130_v54, %v129_v53 }
  0x43   :  { %1218 = vmatpush3.bf16.msra.mxu0 %v1217_v24  ;;  %v179_v60 = vld [vmem:[#allocation6 + $0x3a0] sm:$0xff]  ;;  %v180_v61 = vld [vmem:[#allocation6 + $0x3a8] sm:$0xff]  ;;  %v1293_v63 = vpack.c.bf16 %v162_v57, %v161_v55  ;;  %v1263_v0 = vpack.c.bf16 %v148_v59, %v147_v58  ;;  %v149_v6 = vld [vmem:[#allocation6 + $0x2b0] sm:$0xff] }
  0x44   :  { %1250 = vmatpush3.bf16.msra.mxu1 %v1249_v25  ;;  %1220 = vmatprep.subr.bf16.mxu0 %v1219_v26  ;;  %v131_v1 = vld [vmem:[#allocation6 + $0x220] sm:$0xff]  ;;  %v132_v2 = vld [vmem:[#allocation6 + $0x228] sm:$0xff]  ;;  %v1295_v4 = vpack.c.bf16 %v180_v61, %v179_v60  ;;  %v150_v7 = vld [vmem:[#allocation6 + $0x2b8] sm:$0xff] }
  0x45   :  { %1252 = vmatprep.subr.bf16.mxu1 %v1251_v30  ;;  %v163_v3 = vld [vmem:[#allocation6 + $0x320] sm:$0xff]  ;;  %v164_v5 = vld [vmem:[#allocation6 + $0x328] sm:$0xff]  ;;  %v181_v8 = vld [vmem:[#allocation6 + $0x3b0] sm:$0xff]  ;;  %v1265_v10 = vpack.c.bf16 %v132_v2, %v131_v1  ;;  %v1267_v12 = vpack.c.bf16 %v150_v7, %v149_v6 }
  0x46   :  { %v182_v9 = vld [vmem:[#allocation6 + $0x3b8] sm:$0xff]  ;;  %v1297_v11 = vpack.c.bf16 %v164_v5, %v163_v3  ;;  %v133_v13 = vld [vmem:[#allocation6 + $0x230] sm:$0xff]  ;;  %v151_v18 = vld [vmem:[#allocation6 + $0x2c0] sm:$0xff] }
  0x47   :  { %1222 = vmatpush3.bf16.msra.mxu0 %v1221_v36  ;;  %v134_v14 = vld [vmem:[#allocation6 + $0x238] sm:$0xff]  ;;  %v165_v15 = vld [vmem:[#allocation6 + $0x330] sm:$0xff]  ;;  %v1299_v16 = vpack.c.bf16 %v182_v9, %v181_v8  ;;  %v152_v19 = vld [vmem:[#allocation6 + $0x2c8] sm:$0xff] }
  0x48   :  { %1254 = vmatpush3.bf16.msra.mxu1 %v1253_v37  ;;  %1256 = vmatprep.subr.bf16.mxu0 %v1255_v38  ;;  %v166_v17 = vld [vmem:[#allocation6 + $0x338] sm:$0xff]  ;;  %v183_v20 = vld [vmem:[#allocation6 + $0x3c0] sm:$0xff]  ;;  %v184_v21 = vld [vmem:[#allocation6 + $0x3c8] sm:$0xff]  ;;  %v1269_v22 = vpack.c.bf16 %v134_v14, %v133_v13  ;;  %v1271_v26 = vpack.c.bf16 %v152_v19, %v151_v18 }
  0x49   :  { %1288 = vmatprep.subr.bf16.mxu1 %v1287_v42  ;;  %v135_v23 = vld [vmem:[#allocation6 + $0x240] sm:$0xff]  ;;  %v52_v24 = vld [vmem:[#allocation3 + $0x28] sm:$0xff]  ;;  %v1301_v25 = vpack.c.bf16 %v166_v17, %v165_v15  ;;  %v54_v29 = vld [vmem:[#allocation3 + $0x38] sm:$0xff]  ;;  %v1303_v30 = vpack.c.bf16 %v184_v21, %v183_v20 }
  0x4a   :  { %384 = vmatmul.mubr.f32.vlgmr.msra.gmra.mrb[0].mxu0 %v47_v48  ;;  %v136_v27 = vld [vmem:[#allocation6 + $0x248] sm:$0xff]  ;;  %v167_v28 = vld [vmem:[#allocation6 + $0x340] sm:$0xff]  ;;  %v153_v32 = vld [vmem:[#allocation6 + $0x2d0] sm:$0xff] }
  0x4b   :  { %454 = vmatmul.mubr.f32.vlgmr.msra.gmra.mrb[0].mxu1 %v49_v49  ;;  %1258 = vmatpush3.bf16.msra.mxu0 %v1257_v50  ;;  %v168_v31 = vld [vmem:[#allocation6 + $0x348] sm:$0xff]  ;;  %v154_v33 = vld [vmem:[#allocation6 + $0x2d8] sm:$0xff]  ;;  %v185_v34 = vld [vmem:[#allocation6 + $0x3d0] sm:$0xff]  ;;  %v1273_v36 = vpack.c.bf16 %v136_v27, %v135_v23 }
  0x4c   :  { %1290 = vmatpush3.bf16.msra.mxu1 %v1289_v51  ;;  %1260 = vmatprep.subr.bf16.mxu0 %v1259_v52  ;;  %v186_v35 = vld [vmem:[#allocation6 + $0x3d8] sm:$0xff]  ;;  %v1305_v37 = vpack.c.bf16 %v168_v31, %v167_v28  ;;  %v1275_v38 = vpack.c.bf16 %v154_v33, %v153_v32  ;;  %v137_v39 = vld [vmem:[#allocation6 + $0x250] sm:$0xff]  ;;  %v155_v44 = vld [vmem:[#allocation6 + $0x2e0] sm:$0xff] }
  0x4d   :  { %1292 = vmatprep.subr.bf16.mxu1 %v1291_v56  ;;  %523 = vmatprep.mubr.f32.mxu0 %v52_v24  ;;  %v138_v40 = vld [vmem:[#allocation6 + $0x258] sm:$0xff]  ;;  %v169_v41 = vld [vmem:[#allocation6 + $0x350] sm:$0xff]  ;;  %v1307_v42 = vpack.c.bf16 %v186_v35, %v185_v34  ;;  %v156_v45 = vld [vmem:[#allocation6 + $0x2e8] sm:$0xff] }
  0x4e   :  { %593 = vmatprep.mubr.f32.mxu1 %v54_v29  ;;  %v170_v43 = vld [vmem:[#allocation6 + $0x358] sm:$0xff]  ;;  %v187_v46 = vld [vmem:[#allocation6 + $0x3e0] sm:$0xff]  ;;  %v188_v47 = vld [vmem:[#allocation6 + $0x3e8] sm:$0xff]  ;;  %v1277_v48 = vpack.c.bf16 %v138_v40, %v137_v39  ;;  %v1279_v50 = vpack.c.bf16 %v156_v45, %v155_v44 }
  0x4f   :  { %1262 = vmatpush3.bf16.msra.mxu0 %v1261_v62  ;;  %v1309_v49 = vpack.c.bf16 %v170_v43, %v169_v41  ;;  %v139_v51 = vld [vmem:[#allocation6 + $0x260] sm:$0xff]  ;;  %v140_v52 = vld [vmem:[#allocation6 + $0x268] sm:$0xff]  ;;  %v1311_v54 = vpack.c.bf16 %v188_v47, %v187_v46  ;;  %v157_v56 = vld [vmem:[#allocation6 + $0x2f0] sm:$0xff] }
  0x50   :  { %1294 = vmatpush3.bf16.msra.mxu1 %v1293_v63  ;;  %1264 = vmatprep.subr.bf16.mxu0 %v1263_v0  ;;  %v171_v53 = vld [vmem:[#allocation6 + $0x360] sm:$0xff]  ;;  %v172_v55 = vld [vmem:[#allocation6 + $0x368] sm:$0xff]  ;;  %v158_v57 = vld [vmem:[#allocation6 + $0x2f8] sm:$0xff]  ;;  %v1281_v60 = vpack.c.bf16 %v140_v52, %v139_v51 }
  0x51   :  { %1296 = vmatprep.subr.bf16.mxu1 %v1295_v4  ;;  %v189_v58 = vld [vmem:[#allocation6 + $0x3f0] sm:$0xff]  ;;  %v190_v59 = vld [vmem:[#allocation6 + $0x3f8] sm:$0xff]  ;;  %v1313_v61 = vpack.c.bf16 %v172_v55, %v171_v53  ;;  %v1283_v62 = vpack.c.bf16 %v158_v57, %v157_v56  ;;  %v207_v4 = vld [vmem:[#allocation6 + $0x480] sm:$0xff] }
  0x52   :  { %v141_v63 = vld [vmem:[#allocation6 + $0x270] sm:$0xff]  ;;  %v142_v0 = vld [vmem:[#allocation6 + $0x278] sm:$0xff]  ;;  %v1315_v2 = vpack.c.bf16 %v190_v59, %v189_v58  ;;  %v208_v5 = vld [vmem:[#allocation6 + $0x488] sm:$0xff] }
  0x53   :  { %1266 = vmatpush3.bf16.msra.mxu0 %v1265_v10  ;;  %v173_v1 = vld [vmem:[#allocation6 + $0x370] sm:$0xff]  ;;  %v174_v3 = vld [vmem:[#allocation6 + $0x378] sm:$0xff]  ;;  %v239_v6 = vld [vmem:[#allocation6 + $0x580] sm:$0xff]  ;;  %v1285_v8 = vpack.c.bf16 %v142_v0, %v141_v63  ;;  %v1319_v10 = vpack.c.bf16 %v208_v5, %v207_v4 }
  0x54   :  { %1298 = vmatpush3.bf16.msra.mxu1 %v1297_v11  ;;  %1268 = vmatprep.subr.bf16.mxu0 %v1267_v12  ;;  %v240_v7 = vld [vmem:[#allocation6 + $0x588] sm:$0xff]  ;;  %v1317_v9 = vpack.c.bf16 %v174_v3, %v173_v1  ;;  %v191_v11 = vld [vmem:[#allocation6 + $0x400] sm:$0xff]  ;;  %v210_v17 = vld [vmem:[#allocation6 + $0x498] sm:$0xff] }
  0x55   :  { %1300 = vmatprep.subr.bf16.mxu1 %v1299_v16  ;;  %v192_v12 = vld [vmem:[#allocation6 + $0x408] sm:$0xff]  ;;  %v223_v13 = vld [vmem:[#allocation6 + $0x500] sm:$0xff]  ;;  %v1351_v14 = vpack.c.bf16 %v240_v7, %v239_v6  ;;  %v209_v16 = vld [vmem:[#allocation6 + $0x490] sm:$0xff] }
  0x56   :  { %v224_v15 = vld [vmem:[#allocation6 + $0x508] sm:$0xff]  ;;  %v241_v18 = vld [vmem:[#allocation6 + $0x590] sm:$0xff]  ;;  %v242_v19 = vld [vmem:[#allocation6 + $0x598] sm:$0xff]  ;;  %v1321_v21 = vpack.c.bf16 %v192_v12, %v191_v11  ;;  %v1323_v24 = vpack.c.bf16 %v210_v17, %v209_v16 }
  0x57   :  { %1270 = vmatpush3.bf16.msra.mxu0 %v1269_v22  ;;  %v51_v20 = vld [vmem:[#allocation3 + $0x20] sm:$0xff]  ;;  %v53_v22 = vld [vmem:[#allocation3 + $0x30] sm:$0xff]  ;;  %v1353_v23 = vpack.c.bf16 %v224_v15, %v223_v13  ;;  %v1355_v28 = vpack.c.bf16 %v242_v19, %v241_v18  ;;  %v226_v29 = vld [vmem:[#allocation6 + $0x518] sm:$0xff] }
  0x58   :  { %1302 = vmatpush3.bf16.msra.mxu1 %v1301_v25  ;;  %1272 = vmatprep.subr.bf16.mxu0 %v1271_v26  ;;  %v193_v25 = vld [vmem:[#allocation6 + $0x410] sm:$0xff]  ;;  %v194_v26 = vld [vmem:[#allocation6 + $0x418] sm:$0xff]  ;;  %v212_v31 = vld [vmem:[#allocation6 + $0x4a8] sm:$0xff] }
  0x59   :  { %1304 = vmatprep.subr.bf16.mxu1 %v1303_v30  ;;  %v225_v27 = vld [vmem:[#allocation6 + $0x510] sm:$0xff]  ;;  %v211_v30 = vld [vmem:[#allocation6 + $0x4a0] sm:$0xff]  ;;  %v244_v33 = vld [vmem:[#allocation6 + $0x5a8] sm:$0xff]  ;;  %v1325_v35 = vpack.c.bf16 %v194_v26, %v193_v25 }
  0x5a   :  { %v243_v32 = vld [vmem:[#allocation6 + $0x5a0] sm:$0xff]  ;;  %v56_v34 = vld [vmem:[#allocation3 + $0x48] sm:$0xff]  ;;  %v213_v44 = vld [vmem:[#allocation6 + $0x4b0] sm:$0xff] }
  0x5b   :  { %1274 = vmatpush3.bf16.msra.mxu0 %v1273_v36  ;;  %v58_v36 = vld [vmem:[#allocation3 + $0x58] sm:$0xff]  ;;  %v195_v39 = vld [vmem:[#allocation6 + $0x420] sm:$0xff]  ;;  %v196_v40 = vld [vmem:[#allocation6 + $0x428] sm:$0xff] }
  0x5c   :  { %1306 = vmatpush3.bf16.msra.mxu1 %v1305_v37  ;;  %1276 = vmatprep.subr.bf16.mxu0 %v1275_v38  ;;  %v1357_v37 = vpack.c.bf16 %v226_v29, %v225_v27  ;;  %v1327_v38 = vpack.c.bf16 %v212_v31, %v211_v30  ;;  %v227_v41 = vld [vmem:[#allocation6 + $0x520] sm:$0xff]  ;;  %v228_v43 = vld [vmem:[#allocation6 + $0x528] sm:$0xff]  ;;  %v214_v45 = vld [vmem:[#allocation6 + $0x4b8] sm:$0xff] }
  0x5d   :  { %1308 = vmatprep.subr.bf16.mxu1 %v1307_v42  ;;  %v1359_v42 = vpack.c.bf16 %v244_v33, %v243_v32  ;;  %v245_v46 = vld [vmem:[#allocation6 + $0x5b0] sm:$0xff]  ;;  %v246_v47 = vld [vmem:[#allocation6 + $0x5b8] sm:$0xff]  ;;  %v215_v56 = vld [vmem:[#allocation6 + $0x4c0] sm:$0xff] }
  0x5e   :  { %v197_v51 = vld [vmem:[#allocation6 + $0x430] sm:$0xff]  ;;  %v198_v52 = vld [vmem:[#allocation6 + $0x438] sm:$0xff]  ;;  %v216_v57 = vld [vmem:[#allocation6 + $0x4c8] sm:$0xff] }
  0x5f   :  { %1278 = vmatpush3.bf16.msra.mxu0 %v1277_v48  ;;  %v1329_v48 = vpack.c.bf16 %v196_v40, %v195_v39  ;;  %v229_v53 = vld [vmem:[#allocation6 + $0x530] sm:$0xff]  ;;  %v230_v55 = vld [vmem:[#allocation6 + $0x538] sm:$0xff]  ;;  %v247_v58 = vld [vmem:[#allocation6 + $0x5c0] sm:$0xff] }
  0x60   :  { %1310 = vmatpush3.bf16.msra.mxu1 %v1309_v49  ;;  %1280 = vmatprep.subr.bf16.mxu0 %v1279_v50  ;;  %v1361_v49 = vpack.c.bf16 %v228_v43, %v227_v41  ;;  %v1331_v50 = vpack.c.bf16 %v214_v45, %v213_v44  ;;  %v248_v59 = vld [vmem:[#allocation6 + $0x5c8] sm:$0xff]  ;;  %v199_v63 = vld [vmem:[#allocation6 + $0x440] sm:$0xff]  ;;  %v217_v4 = vld [vmem:[#allocation6 + $0x4d0] sm:$0xff] }
  0x61   :  { %1312 = vmatprep.subr.bf16.mxu1 %v1311_v54  ;;  %v1363_v54 = vpack.c.bf16 %v246_v47, %v245_v46  ;;  %v200_v0 = vld [vmem:[#allocation6 + $0x448] sm:$0xff]  ;;  %v231_v1 = vld [vmem:[#allocation6 + $0x540] sm:$0xff]  ;;  %v218_v5 = vld [vmem:[#allocation6 + $0x4d8] sm:$0xff] }
  0x62   :  { %v232_v3 = vld [vmem:[#allocation6 + $0x548] sm:$0xff]  ;;  %v249_v6 = vld [vmem:[#allocation6 + $0x5d0] sm:$0xff]  ;;  %v250_v7 = vld [vmem:[#allocation6 + $0x5d8] sm:$0xff] }
  0x63   :  { %1282 = vmatpush3.bf16.msra.mxu0 %v1281_v60  ;;  %v1333_v60 = vpack.c.bf16 %v198_v52, %v197_v51  ;;  %v201_v11 = vld [vmem:[#allocation6 + $0x450] sm:$0xff]  ;;  %v202_v12 = vld [vmem:[#allocation6 + $0x458] sm:$0xff]  ;;  %v219_v16 = vld [vmem:[#allocation6 + $0x4e0] sm:$0xff] }
  0x64   :  { %1314 = vmatpush3.bf16.msra.mxu1 %v1313_v61  ;;  %1284 = vmatprep.subr.bf16.mxu0 %v1283_v62  ;;  %v1365_v61 = vpack.c.bf16 %v230_v55, %v229_v53  ;;  %v1335_v62 = vpack.c.bf16 %v216_v57, %v215_v56  ;;  %v233_v13 = vld [vmem:[#allocation6 + $0x550] sm:$0xff]  ;;  %v234_v15 = vld [vmem:[#allocation6 + $0x558] sm:$0xff]  ;;  %v220_v17 = vld [vmem:[#allocation6 + $0x4e8] sm:$0xff] }
  0x65   :  { %1316 = vmatprep.subr.bf16.mxu1 %v1315_v2  ;;  %v1367_v2 = vpack.c.bf16 %v248_v59, %v247_v58  ;;  %v251_v18 = vld [vmem:[#allocation6 + $0x5e0] sm:$0xff]  ;;  %v252_v19 = vld [vmem:[#allocation6 + $0x5e8] sm:$0xff]  ;;  %v222_v29 = vld [vmem:[#allocation6 + $0x4f8] sm:$0xff] }
  0x66   :  { %v235_v25 = vld [vmem:[#allocation6 + $0x560] sm:$0xff]  ;;  %v1375_v26 = vpack.c.bf16 %v252_v19, %v251_v18  ;;  %v236_v27 = vld [vmem:[#allocation6 + $0x568] sm:$0xff]  ;;  %v253_v30 = vld [vmem:[#allocation6 + $0x5f0] sm:$0xff] }
  0x67   :  { %1286 = vmatpush3.bf16.msra.mxu0 %v1285_v8  ;;  %v1337_v8 = vpack.c.bf16 %v200_v0, %v199_v63  ;;  %v254_v31 = vld [vmem:[#allocation6 + $0x5f8] sm:$0xff]  ;;  %v1377_v33 = vpack.c.bf16 %v236_v27, %v235_v25  ;;  %v271_v40 = vld [vmem:[#allocation6 + $0x680] sm:$0xff]  ;;  %v272_v41 = vld [vmem:[#allocation6 + $0x688] sm:$0xff] }
  0x68   :  { %1318 = vmatpush3.bf16.msra.mxu1 %v1317_v9  ;;  %1320 = vmatprep.subr.bf16.mxu0 %v1319_v10  ;;  %v1369_v9 = vpack.c.bf16 %v232_v3, %v231_v1  ;;  %v1339_v10 = vpack.c.bf16 %v218_v5, %v217_v4  ;;  %v238_v39 = vld [vmem:[#allocation6 + $0x578] sm:$0xff]  ;;  %v304_v43 = vld [vmem:[#allocation6 + $0x788] sm:$0xff]  ;;  %v1383_v46 = vpack.c.bf16 %v272_v41, %v271_v40  ;;  %v255_v47 = vld [vmem:[#allocation6 + $0x600] sm:$0xff] }
  0x69   :  { %1352 = vmatprep.subr.bf16.mxu1 %v1351_v14  ;;  %v1371_v14 = vpack.c.bf16 %v250_v7, %v249_v6  ;;  %v288_v51 = vld [vmem:[#allocation6 + $0x708] sm:$0xff]  ;;  %v273_v52 = vld [vmem:[#allocation6 + $0x690] sm:$0xff]  ;;  %v274_v53 = vld [vmem:[#allocation6 + $0x698] sm:$0xff] }
  0x6a   :  { %524 = vmatmul.mubr.f32.vlgmr.msra.gmra.mrb[2].mxu0 %v51_v20  ;;  %v1341_v20 = vpack.c.bf16 %v202_v12, %v201_v11  ;;  %v306_v55 = vld [vmem:[#allocation6 + $0x798] sm:$0xff]  ;;  %v55_v56 = vld [vmem:[#allocation3 + $0x40] sm:$0xff]  ;;  %v57_v58 = vld [vmem:[#allocation3 + $0x50] sm:$0xff] }
  0x6b   :  { %1322 = vmatpush3.bf16.msra.mxu0 %v1321_v21  ;;  %594 = vmatmul.mubr.f32.vlgmr.msra.gmra.mrb[2].mxu1 %v53_v22  ;;  %v1373_v21 = vpack.c.bf16 %v234_v15, %v233_v13  ;;  %v1343_v22 = vpack.c.bf16 %v220_v17, %v219_v16  ;;  %v289_v63 = vld [vmem:[#allocation6 + $0x710] sm:$0xff]  ;;  %v290_v1 = vld [vmem:[#allocation6 + $0x718] sm:$0xff]  ;;  %v276_v3 = vld [vmem:[#allocation6 + $0x6a8] sm:$0xff] }
  0x6c   :  { %1354 = vmatpush3.bf16.msra.mxu1 %v1353_v23  ;;  %1324 = vmatprep.subr.bf16.mxu0 %v1323_v24  ;;  %v203_v23 = vld [vmem:[#allocation6 + $0x460] sm:$0xff]  ;;  %v204_v24 = vld [vmem:[#allocation6 + $0x468] sm:$0xff]  ;;  %v277_v16 = vld [vmem:[#allocation6 + $0x6b0] sm:$0xff] }
  0x6d   :  { %1356 = vmatprep.subr.bf16.mxu1 %v1355_v28  ;;  %663 = vmatprep.mubr.f32.mxu0 %v56_v34  ;;  %v221_v28 = vld [vmem:[#allocation6 + $0x4f0] sm:$0xff]  ;;  %v1345_v32 = vpack.c.bf16 %v204_v24, %v203_v23  ;;  %v307_v4 = vld [vmem:[#allocation6 + $0x7a0] sm:$0xff]  ;;  %v308_v5 = vld [vmem:[#allocation6 + $0x7a8] sm:$0xff] }
  0x6e   :  { %733 = vmatprep.mubr.f32.mxu1 %v58_v36  ;;  %v1347_v34 = vpack.c.bf16 %v222_v29, %v221_v28  ;;  %v206_v36 = vld [vmem:[#allocation6 + $0x478] sm:$0xff]  ;;  %v60_v6 = vld [vmem:[#allocation3 + $0x68] sm:$0xff]  ;;  %v259_v11 = vld [vmem:[#allocation6 + $0x620] sm:$0xff] }
  0x6f   :  { %1326 = vmatpush3.bf16.msra.mxu0 %v1325_v35  ;;  %v205_v35 = vld [vmem:[#allocation6 + $0x470] sm:$0xff]  ;;  %v260_v12 = vld [vmem:[#allocation6 + $0x628] sm:$0xff]  ;;  %v291_v13 = vld [vmem:[#allocation6 + $0x720] sm:$0xff] }
  0x70   :  { %1358 = vmatpush3.bf16.msra.mxu1 %v1357_v37  ;;  %1328 = vmatprep.subr.bf16.mxu0 %v1327_v38  ;;  %v237_v37 = vld [vmem:[#allocation6 + $0x570] sm:$0xff]  ;;  %v1379_v38 = vpack.c.bf16 %v254_v31, %v253_v30  ;;  %v1349_v44 = vpack.c.bf16 %v206_v36, %v205_v35  ;;  %v292_v15 = vld [vmem:[#allocation6 + $0x728] sm:$0xff]  ;;  %v278_v17 = vld [vmem:[#allocation6 + $0x6b8] sm:$0xff] }
  0x71   :  { %1360 = vmatprep.subr.bf16.mxu1 %v1359_v42  ;;  %v303_v42 = vld [vmem:[#allocation6 + $0x780] sm:$0xff]  ;;  %v1381_v45 = vpack.c.bf16 %v238_v39, %v237_v37  ;;  %v309_v18 = vld [vmem:[#allocation6 + $0x7b0] sm:$0xff]  ;;  %v310_v19 = vld [vmem:[#allocation6 + $0x7b8] sm:$0xff] }
  0x72   :  { %v261_v23 = vld [vmem:[#allocation6 + $0x630] sm:$0xff]  ;;  %v262_v24 = vld [vmem:[#allocation6 + $0x638] sm:$0xff]  ;;  %v279_v28 = vld [vmem:[#allocation6 + $0x6c0] sm:$0xff] }
  0x73   :  { %1330 = vmatpush3.bf16.msra.mxu0 %v1329_v48  ;;  %v256_v48 = vld [vmem:[#allocation6 + $0x608] sm:$0xff]  ;;  %v293_v25 = vld [vmem:[#allocation6 + $0x730] sm:$0xff]  ;;  %v294_v27 = vld [vmem:[#allocation6 + $0x738] sm:$0xff] }
  0x74   :  { %1362 = vmatpush3.bf16.msra.mxu1 %v1361_v49  ;;  %1332 = vmatprep.subr.bf16.mxu0 %v1331_v50  ;;  %v287_v49 = vld [vmem:[#allocation6 + $0x700] sm:$0xff]  ;;  %v1415_v50 = vpack.c.bf16 %v304_v43, %v303_v42  ;;  %v1385_v57 = vpack.c.bf16 %v256_v48, %v255_v47  ;;  %v280_v29 = vld [vmem:[#allocation6 + $0x6c8] sm:$0xff]  ;;  %v281_v40 = vld [vmem:[#allocation6 + $0x6d0] sm:$0xff] }
  0x75   :  { %1364 = vmatprep.subr.bf16.mxu1 %v1363_v54  ;;  %v305_v54 = vld [vmem:[#allocation6 + $0x790] sm:$0xff]  ;;  %v1417_v59 = vpack.c.bf16 %v288_v51, %v287_v49  ;;  %v311_v30 = vld [vmem:[#allocation6 + $0x7c0] sm:$0xff]  ;;  %v312_v31 = vld [vmem:[#allocation6 + $0x7c8] sm:$0xff] }
  0x76   :  { %v1419_v0 = vpack.c.bf16 %v306_v55, %v305_v54  ;;  %v263_v35 = vld [vmem:[#allocation6 + $0x640] sm:$0xff]  ;;  %v264_v36 = vld [vmem:[#allocation6 + $0x648] sm:$0xff]  ;;  %v282_v41 = vld [vmem:[#allocation6 + $0x6d8] sm:$0xff] }
  0x77   :  { %1334 = vmatpush3.bf16.msra.mxu0 %v1333_v60  ;;  %v1387_v60 = vpack.c.bf16 %v274_v53, %v273_v52  ;;  %v295_v37 = vld [vmem:[#allocation6 + $0x740] sm:$0xff]  ;;  %v296_v39 = vld [vmem:[#allocation6 + $0x748] sm:$0xff]  ;;  %v313_v42 = vld [vmem:[#allocation6 + $0x7d0] sm:$0xff] }
  0x78   :  { %1366 = vmatpush3.bf16.msra.mxu1 %v1365_v61  ;;  %1336 = vmatprep.subr.bf16.mxu0 %v1335_v62  ;;  %v257_v61 = vld [vmem:[#allocation6 + $0x610] sm:$0xff]  ;;  %v258_v62 = vld [vmem:[#allocation6 + $0x618] sm:$0xff]  ;;  %v283_v52 = vld [vmem:[#allocation6 + $0x6e0] sm:$0xff] }
  0x79   :  { %1368 = vmatprep.subr.bf16.mxu1 %v1367_v2  ;;  %v275_v2 = vld [vmem:[#allocation6 + $0x6a0] sm:$0xff]  ;;  %v1389_v7 = vpack.c.bf16 %v258_v62, %v257_v61  ;;  %v314_v43 = vld [vmem:[#allocation6 + $0x7d8] sm:$0xff]  ;;  %v265_v47 = vld [vmem:[#allocation6 + $0x650] sm:$0xff] }
  0x7a   :  { %v266_v48 = vld [vmem:[#allocation6 + $0x658] sm:$0xff]  ;;  %v297_v49 = vld [vmem:[#allocation6 + $0x750] sm:$0xff]  ;;  %v284_v53 = vld [vmem:[#allocation6 + $0x6e8] sm:$0xff] }
  0x7b   :  { %1338 = vmatpush3.bf16.msra.mxu0 %v1337_v8  ;;  %v62_v8 = vld [vmem:[#allocation3 + $0x78] sm:$0xff]  ;;  %v315_v54 = vld [vmem:[#allocation6 + $0x7e0] sm:$0xff]  ;;  %v316_v55 = vld [vmem:[#allocation6 + $0x7e8] sm:$0xff] }
  0x7c   :  { %1370 = vmatpush3.bf16.msra.mxu1 %v1369_v9  ;;  %1340 = vmatprep.subr.bf16.mxu0 %v1339_v10  ;;  %v1421_v9 = vpack.c.bf16 %v290_v1, %v289_v63  ;;  %v1391_v10 = vpack.c.bf16 %v276_v3, %v275_v2  ;;  %v298_v51 = vld [vmem:[#allocation6 + $0x758] sm:$0xff]  ;;  %v299_v61 = vld [vmem:[#allocation6 + $0x760] sm:$0xff]  ;;  %v1439_v62 = vpack.c.bf16 %v316_v55, %v315_v54  ;;  %v300_v63 = vld [vmem:[#allocation6 + $0x768] sm:$0xff] }
  0x7d   :  { %1372 = vmatprep.subr.bf16.mxu1 %v1371_v14  ;;  %v1423_v14 = vpack.c.bf16 %v308_v5, %v307_v4  ;;  %v286_v1 = vld [vmem:[#allocation6 + $0x6f8] sm:$0xff]  ;;  %v317_v2 = vld [vmem:[#allocation6 + $0x7f0] sm:$0xff]  ;;  %v1441_v5 = vpack.c.bf16 %v300_v63, %v299_v61 }
  0x7e   :  { %v318_v3 = vld [vmem:[#allocation6 + $0x7f8] sm:$0xff] }
  0x7f   :  { %1342 = vmatpush3.bf16.msra.mxu0 %v1341_v20  ;;  %v1393_v20 = vpack.c.bf16 %v260_v12, %v259_v11  ;;  %v302_v11 = vld [vmem:[#allocation6 + $0x778] sm:$0xff] }
  0x80   :  { %1374 = vmatpush3.bf16.msra.mxu1 %v1373_v21  ;;  %1344 = vmatprep.subr.bf16.mxu0 %v1343_v22  ;;  %v1425_v21 = vpack.c.bf16 %v292_v15, %v291_v13  ;;  %v1395_v22 = vpack.c.bf16 %v278_v17, %v277_v16  ;;  %v61_v15 = vld [vmem:[#allocation3 + $0x70] sm:$0xff] }
  0x81   :  { %1376 = vmatprep.subr.bf16.mxu1 %v1375_v26  ;;  %v1427_v26 = vpack.c.bf16 %v310_v19, %v309_v18 }
  0x83   :  { %1346 = vmatpush3.bf16.msra.mxu0 %v1345_v32  ;;  %v1397_v32 = vpack.c.bf16 %v262_v24, %v261_v23 }
  0x84   :  { %1378 = vmatpush3.bf16.msra.mxu1 %v1377_v33  ;;  %1348 = vmatprep.subr.bf16.mxu0 %v1347_v34  ;;  %v1429_v33 = vpack.c.bf16 %v294_v27, %v293_v25  ;;  %v1399_v34 = vpack.c.bf16 %v280_v29, %v279_v28 }
  0x85   :  { %1380 = vmatprep.subr.bf16.mxu1 %v1379_v38  ;;  %v1431_v38 = vpack.c.bf16 %v312_v31, %v311_v30 }
  0x87   :  { %1350 = vmatpush3.bf16.msra.mxu0 %v1349_v44  ;;  %v1401_v44 = vpack.c.bf16 %v264_v36, %v263_v35 }
  0x88   :  { %1382 = vmatpush3.bf16.msra.mxu1 %v1381_v45  ;;  %1384 = vmatprep.subr.bf16.mxu0 %v1383_v46  ;;  %v1433_v45 = vpack.c.bf16 %v296_v39, %v295_v37  ;;  %v1403_v46 = vpack.c.bf16 %v282_v41, %v281_v40 }
  0x89   :  { %1416 = vmatprep.subr.bf16.mxu1 %v1415_v50  ;;  %v1435_v50 = vpack.c.bf16 %v314_v43, %v313_v42 }
  0x8a   :  { %664 = vmatmul.mubr.f32.vlgmr.msra.gmra.mrb[4].mxu0 %v55_v56  ;;  %v1405_v56 = vpack.c.bf16 %v266_v48, %v265_v47 }
  0x8b   :  { %1386 = vmatpush3.bf16.msra.mxu0 %v1385_v57  ;;  %734 = vmatmul.mubr.f32.vlgmr.msra.gmra.mrb[4].mxu1 %v57_v58  ;;  %v1437_v57 = vpack.c.bf16 %v298_v51, %v297_v49  ;;  %v1407_v58 = vpack.c.bf16 %v284_v53, %v283_v52 }
  0x8c   :  { %1418 = vmatpush3.bf16.msra.mxu1 %v1417_v59  ;;  %1388 = vmatprep.subr.bf16.mxu0 %v1387_v60  ;;  %v267_v59 = vld [vmem:[#allocation6 + $0x660] sm:$0xff]  ;;  %v268_v60 = vld [vmem:[#allocation6 + $0x668] sm:$0xff] }
  0x8d   :  { %1420 = vmatprep.subr.bf16.mxu1 %v1419_v0  ;;  %803 = vmatprep.mubr.f32.mxu0 %v60_v6  ;;  %v285_v0 = vld [vmem:[#allocation6 + $0x6f0] sm:$0xff]  ;;  %v1409_v4 = vpack.c.bf16 %v268_v60, %v267_v59 }
  0x8e   :  { %873 = vmatprep.mubr.f32.mxu1 %v62_v8  ;;  %v1411_v6 = vpack.c.bf16 %v286_v1, %v285_v0  ;;  %v270_v8 = vld [vmem:[#allocation6 + $0x678] sm:$0xff] }
  0x8f   :  { %1390 = vmatpush3.bf16.msra.mxu0 %v1389_v7  ;;  %v269_v7 = vld [vmem:[#allocation6 + $0x670] sm:$0xff] }
  0x90   :  { %1422 = vmatpush3.bf16.msra.mxu1 %v1421_v9  ;;  %1392 = vmatprep.subr.bf16.mxu0 %v1391_v10  ;;  %v1443_v9 = vpack.c.bf16 %v318_v3, %v317_v2  ;;  %v301_v10 = vld [vmem:[#allocation6 + $0x770] sm:$0xff]  ;;  %v1413_v12 = vpack.c.bf16 %v270_v8, %v269_v7 }
  0x91   :  { %1424 = vmatprep.subr.bf16.mxu1 %v1423_v14  ;;  %v1445_v13 = vpack.c.bf16 %v302_v11, %v301_v10  ;;  %v59_v14 = vld [vmem:[#allocation3 + $0x60] sm:$0xff] }
  0x93   :  { %1394 = vmatpush3.bf16.msra.mxu0 %v1393_v20 }
  0x94   :  { %1426 = vmatpush3.bf16.msra.mxu1 %v1425_v21  ;;  %1396 = vmatprep.subr.bf16.mxu0 %v1395_v22 }
  0x95   :  { %1428 = vmatprep.subr.bf16.mxu1 %v1427_v26 }
  0x97   :  { %1398 = vmatpush3.bf16.msra.mxu0 %v1397_v32 }
  0x98   :  { %1430 = vmatpush3.bf16.msra.mxu1 %v1429_v33  ;;  %1400 = vmatprep.subr.bf16.mxu0 %v1399_v34 }
  0x99   :  { %1432 = vmatprep.subr.bf16.mxu1 %v1431_v38 }
  0x9b   :  { %1402 = vmatpush3.bf16.msra.mxu0 %v1401_v44 }
  0x9c   :  { %1434 = vmatpush3.bf16.msra.mxu1 %v1433_v45  ;;  %1404 = vmatprep.subr.bf16.mxu0 %v1403_v46  ;;  %v910_v46 = vld [vmem:[%s1597_s2] ss:$0 sm:$0xff] }
  0x9d   :  { %1436 = vmatprep.subr.bf16.mxu1 %v1435_v50 }
  0x9f   :  { %1406 = vmatpush3.bf16.msra.mxu0 %v1405_v56 }
  0xa0   :  { %1438 = vmatpush3.bf16.msra.mxu1 %v1437_v57  ;;  %1408 = vmatprep.subr.bf16.mxu0 %v1407_v58 }
  0xa1   :  { %1440 = vmatprep.subr.bf16.mxu1 %v1439_v62 }
  0xa3   :  { %1410 = vmatpush3.bf16.msra.mxu0 %v1409_v4 }
  0xa4   :  { %1442 = vmatpush3.bf16.msra.mxu1 %v1441_v5  ;;  %1412 = vmatprep.subr.bf16.mxu0 %v1411_v6 }
  0xa5   :  { %1444 = vmatprep.subr.bf16.mxu1 %v1443_v9 }
  0xa7   :  { %1414 = vmatpush3.bf16.msra.mxu0 %v1413_v12 }
  0xa8   :  { %1446 = vmatpush3.bf16.msra.mxu1 %v1445_v13 }
  0xaa   :  { %804 = vmatmul.mubr.f32.vlgmr.msra.gmra.mrb[6].mxu0 %v59_v14 }
  0xab   :  { %874 = vmatmul.mubr.f32.vlgmr.msra.gmra.mrb[6].mxu1 %v61_v15 }
 0x11d   :  { %v943_v16 = vpop.f32.mrb[0].mxu0 }
 0x11e   :  { %v978_v17 = vpop.f32.mrb[0].mxu1  ;;  %v944_v18 = vpop.f32.mrb[1].mxu0 }
 0x11f   :  { %v945_v19 = vadd.f32 %v944_v18, %v943_v16  ;;  %v979_v20 = vpop.f32.mrb[1].mxu1 }
 0x120   :  { %v980_v21 = vadd.f32 %v979_v20, %v978_v17 }
 0x122   :  { %v456_v22 = vadd.f32 %v980_v21, %v945_v19 }
 0x13d   :  { %v1013_v23 = vpop.f32.mrb[2].mxu0 }
 0x13e   :  { %v1014_v24 = vpop.f32.mrb[3].mxu0  ;;  %v1048_v25 = vpop.f32.mrb[2].mxu1 }
 0x13f   :  { %v1015_v26 = vadd.f32 %v1014_v24, %v1013_v23  ;;  %v1049_v27 = vpop.f32.mrb[3].mxu1 }
 0x140   :  { %v1050_v28 = vadd.f32 %v1049_v27, %v1048_v25 }
 0x141   :  { %v526_v29 = vadd.f32 %v1015_v26, %v456_v22 }
 0x143   :  { %v596_v30 = vadd.f32 %v1050_v28, %v526_v29 }
 0x15d   :  { %v1083_v31 = vpop.f32.mrb[4].mxu0 }
 0x15e   :  { %v1084_v32 = vpop.f32.mrb[5].mxu0  ;;  %v1118_v33 = vpop.f32.mrb[4].mxu1 }
 0x15f   :  { %v1085_v34 = vadd.f32 %v1084_v32, %v1083_v31  ;;  %v1119_v35 = vpop.f32.mrb[5].mxu1 }
 0x160   :  { %v1120_v36 = vadd.f32 %v1119_v35, %v1118_v33 }
 0x161   :  { %v666_v37 = vadd.f32 %v1085_v34, %v596_v30 }
 0x163   :  { %v736_v38 = vadd.f32 %v1120_v36, %v666_v37 }
 0x17d   :  { %v1153_v39 = vpop.f32.mrb[6].mxu0 }
 0x17e   :  { %v1154_v40 = vpop.f32.mrb[7].mxu0  ;;  %v1188_v41 = vpop.f32.mrb[6].mxu1 }
 0x17f   :  { %v1155_v42 = vadd.f32 %v1154_v40, %v1153_v39  ;;  %v1189_v43 = vpop.f32.mrb[7].mxu1 }
 0x180   :  { %v1190_v44 = vadd.f32 %v1189_v43, %v1188_v41 }
 0x181   :  { %v806_v45 = vadd.f32 %v1155_v42, %v736_v38 }
 0x183   :  { %v876_v47 = vadd.f32 %v1190_v44, %v806_v45 }
 0x185   :  { %v892_v48 = vadd.f32 %v910_v46, %v876_v47 }
 0x187   :  { %893 = vst [vmem:[#allocation8] sm:$0xff] %v892_v48 }
 0x188   :  { %1507 = shalt.err (!%p1504_p6)
}
 0x189   :  { %s1508_s16 = scalar_lea.hbm %s1598_s3, 128 }
 0x18a   :  { %p1509_p7 = scmp.ne.s32.totalorder %s1598_s3, %s1508_s16  ;;  %p1512_p8 = scmp.lt.u32.totalorder %s1508_s16, %s1598_s3 }
 0x18c   :  { %p1514_p9 = pnand %p1512_p8, %p1509_p7 }
 0x18e   :  { %1517 = shalt.err (!%p1514_p9)
}
 0x18f   :  { %903 = dma.vmem_to_hbm [thread:$0]  %s901_s12, 128, %s1598_s3, [#allocation5]  }
 0x190   :  { %1522 = dma.done.wait [#allocation5], 128  }
 0x191   :  { %1523 = vsyncadd [#allocation5], 4294967168 }
 0x192   :  { %907 = vsyncpa [#allocation4], 1 }
 0x193   :  { %908 = vsyncpa [#allocation7], 1 }
 0x194   :  { %909 = vsyncpa [#allocation5], 1 }

</bundles_post_ra>
